<compile_context>
chip_gen: v7x
topology: tpu7x:2x2x1
jax: 0.10.0
libtpu: 0.0.40
codegen_flags: <defaults>
</compile_context>

<pallas_src>
import jax
import jax.numpy as jnp
from jax.experimental import pallas as pl
from jax.experimental.pallas import tpu as pltpu


def _rescale_kernel(w_ref, x_ref, o_ref):
    # w_ref: (bm, 1) per-row weights OR (1, bl) per-lane weights; broadcasts.
    # x_ref stays in the input dtype; promotion to o_ref.dtype happens here.
    o_ref[...] = (x_ref[...] * w_ref[...]).astype(o_ref.dtype)


# Budget for the double-buffered (in + out + weight) tile set. Kept at ~32 MiB
# so it fits every generation's scoped VMEM with the explicit 48 MiB limit
# below (v7x has only 64 MiB/TC physical).
_TILE_VMEM_BUDGET = 32 * 1024 * 1024


def _plan_tiles(R, L, lane_blockable, x_item, out_item):
    """Pick (bm, bl) block sizes for a (R, L) elementwise stream."""
    per_elem = x_item + out_item

    # Lane (last) dim: prefer bl = L (one fully contiguous DMA per buffer);
    # only split lanes when a full row at the minimum 8-row block is too big.
    max_lane = _TILE_VMEM_BUDGET // (2 * per_elem * 8)
    if L <= max_lane or not lane_blockable:
        bl = L
    else:
        bl = max(128, 128 * (max_lane // 128))

    # Sublane dim: fill the remaining budget. The (bm, 1) weight column is
    # lane-padded to (bm, 128) in VMEM, so account for it.
    per_row = 2 * (bl * per_elem + 128 * out_item)
    bm = max(8, 8 * ((_TILE_VMEM_BUDGET // per_row) // 8))
    if bm >= R:
        bm = R
    if bl >= L:
        bl = L

    # v7x megacore: make sure there are >= 2 blocks along a parallel axis when
    # the shape allows it, so both TensorCores get work (harmless on 1-TC chips).
    if pl.cdiv(R, bm) * pl.cdiv(L, bl) == 1:
        if R >= 16:
            bm = max(8, 8 * ((bm // 2) // 8))
        elif lane_blockable and L >= 256:
            bl = max(128, 128 * ((bl // 2) // 128))

    return bm, bl


def rescale(x: jax.Array, weight: jax.Array) -> jax.Array:
    """Per-channel rescale. x: (N, C, H, W); weight: (C, 1, 1) or (C,)."""
    N, C, H, W = x.shape
    L = H * W
    # Match PyTorch promotion: bf16 x * f32 weight -> f32 output.
    out_dtype = jnp.result_type(x.dtype, weight.dtype)
    w_vec = weight.reshape(C).astype(out_dtype)  # tiny (C,) vector

    if L % 128 == 0:
        # Primary lane-dense layout: rows are (n, c) pairs, lanes are H*W.
        R2, L2 = N * C, L
        x2 = x.reshape(R2, L2)                      # metadata-only reshape
        w_arr = jnp.tile(w_vec, N).reshape(R2, 1)   # row r = n*C + c -> channel c
        w_is_col = True
        lane_blockable = True
    else:
        # Small / odd spatial sizes: fold channels into the lane dim so stores
        # stay lane-dense (C*H*W lanes instead of a sparse H*W).
        R2, L2 = N, C * L
        x2 = x.reshape(R2, L2)
        w_arr = jnp.repeat(w_vec, L).reshape(1, L2)
        w_is_col = False
        lane_blockable = (L2 % 128 == 0)

    x_item = jnp.dtype(x.dtype).itemsize
    out_item = jnp.dtype(out_dtype).itemsize
    bm, bl = _plan_tiles(R2, L2, lane_blockable, x_item, out_item)

    grid = (pl.cdiv(R2, bm), pl.cdiv(L2, bl))  # (rows, cols): j (cols) fastest

    if w_is_col:
        # Block index fixed at (i, 0): unchanged across inner j steps -> no re-DMA.
        w_spec = pl.BlockSpec((bm, 1), lambda i, j: (i, 0))
    else:
        w_spec = pl.BlockSpec((1, bl), lambda i, j: (0, j))

    cost = pl.CostEstimate(
        flops=R2 * L2,
        transcendentals=0,
        bytes_accessed=(x2.size * x_item
                        + w_arr.size * out_item
                        + R2 * L2 * out_item),
    )

    out2 = pl.pallas_call(
        _rescale_kernel,
        out_shape=jax.ShapeDtypeStruct((R2, L2), out_dtype),
        grid=grid,
        in_specs=[
            w_spec,
            pl.BlockSpec((bm, bl), lambda i, j: (i, j)),
        ],
        out_specs=pl.BlockSpec((bm, bl), lambda i, j: (i, j)),
        compiler_params=pltpu.CompilerParams(
            dimension_semantics=("parallel", "parallel"),
            vmem_limit_bytes=48 * 1024 * 1024,
        ),
        cost_estimate=cost,
    )(w_arr, x2)

    return out2.reshape(N, C, H, W)


if __name__ == "__main__":
    key = jax.random.PRNGKey(0)
    kx, kw, kx2 = jax.random.split(key, 3)

    # --- Primary path: N=2, C=4, H=W=16 (L % 128 == 0), f32.
    N, C, H, W = 2, 4, 16, 16
    x = jax.random.normal(kx, (N, C, H, W), dtype=jnp.float32)
    # nn.Parameter(torch.ones(C, 1, 1)) -> ones init; perturb so broadcast is exercised.
    weight = jnp.ones((C, 1, 1), jnp.float32) + 0.1 * jax.random.normal(
        kw, (C, 1, 1), dtype=jnp.float32
    )

    out = jax.block_until_ready(rescale(x, weight))
    ref = weight[None, :, :, :] * x
    assert out.shape == x.shape and out.dtype == ref.dtype
    assert jnp.allclose(out, ref, atol=1e-6, rtol=1e-6)

    # --- Mixed precision: bf16 activations, f32 weight (promotion in-kernel).
    x_bf16 = x.astype(jnp.bfloat16)
    out_mp = jax.block_until_ready(rescale(x_bf16, weight))
    ref_mp = weight[None, :, :, :] * x_bf16
    assert out_mp.dtype == ref_mp.dtype
    assert jnp.allclose(out_mp, ref_mp, atol=1e-5, rtol=1e-5)

    # --- Fallback lane-dense path: odd spatial size (7x7 -> L % 128 != 0).
    x_small = jax.random.normal(kx2, (2, 4, 7, 7), dtype=jnp.float32)
    out_small = jax.block_until_ready(rescale(x_small, weight))
    ref_small = weight[None, :, :, :] * x_small
    assert jnp.allclose(out_small, ref_small, atol=1e-6, rtol=1e-6)

    print("KERNEL_OK")
</pallas_src>

<mosaic_0001>
module attributes {stable_mosaic.version = 11 : i64} {
  func.func @_rescale_kernel(%arg0: i32, %arg1: i32, %arg2: memref<8x1xf32, #tpu.memory_space<vmem>>, %arg3: memref<8x128xf32, #tpu.memory_space<vmem>>, %arg4: memref<8x128xf32, #tpu.memory_space<vmem>>) attributes {dimension_semantics = [#tpu.dimension_semantics<parallel>, #tpu.dimension_semantics<parallel>], iteration_bounds = array<i64: 1, 2>, scalar_prefetch = 0 : i64, scratch_operands = 0 : i64, tpu.core_type = #tpu.core_type<tc>, window_params = [{transform_indices = @transform_0, window_bounds = array<i64: 8, 1>}, {transform_indices = @transform_1, window_bounds = array<i64: 8, 128>}, {transform_indices = @transform_2, window_bounds = array<i64: 8, 128>}]} {
    %c0 = arith.constant 0 : index
    %c0_0 = arith.constant 0 : index
    %0 = vector.load %arg3[%c0, %c0_0] : memref<8x128xf32, #tpu.memory_space<vmem>>, vector<8x128xf32>
    %c0_1 = arith.constant 0 : index
    %c0_2 = arith.constant 0 : index
    %1 = vector.load %arg2[%c0_1, %c0_2] : memref<8x1xf32, #tpu.memory_space<vmem>>, vector<8x1xf32>
    %2 = vector.broadcast %1 : vector<8x1xf32> to vector<8x128xf32>
    %3 = arith.mulf %0, %2 : vector<8x128xf32>
    %c0_3 = arith.constant 0 : index
    %c0_4 = arith.constant 0 : index
    %4 = vector.load %arg4[%c0_3, %c0_4] : memref<8x128xf32, #tpu.memory_space<vmem>>, vector<8x128xf32>
    tpu.vector_store %arg4[%c0_3, %c0_4], %3 {strides = array<i32>} : memref<8x128xf32, #tpu.memory_space<vmem>>, vector<8x128xf32>,
    return
  }
  func.func @transform_0(%arg0: i32, %arg1: i32) -> (i32, i32) {
    %c0_i32 = arith.constant 0 : i32
    %c0_i32_0 = arith.constant 0 : i32
    return %arg0, %c0_i32 : i32, i32
  }
  func.func @transform_1(%arg0: i32, %arg1: i32) -> (i32, i32) {
    %c0_i32 = arith.constant 0 : i32
    return %arg0, %arg1 : i32, i32
  }
  func.func @transform_2(%arg0: i32, %arg1: i32) -> (i32, i32) {
    %c0_i32 = arith.constant 0 : i32
    return %arg0, %arg1 : i32, i32
  }
}

</mosaic_0001>

<bundles_post_ra>
// kernel: tpu_custom_call.1
= control target key start
LH: loop header
LB: loop body
LE: loop exit
PB: predicated region body
PF: predicated region fallthrough
CT: control target
= control target key end

     0   :  { %7 = vsyncpa [#allocation3], 0  ;;  %s701_s0 = inlined_call_operand.vmem [shape: f32[8,1], index: 0, kind: input, shape index: {}]   ;;  %s702_s1 = inlined_call_operand.hbm [shape: f32[8,256], index: 1, kind: input, shape index: {}]   ;;  %s703_s2 = inlined_call_operand.hbm [shape: f32[8,256], index: 2, kind: output, shape index: {}]  }
   0x1   :  { %9 = vsyncpa [#allocation3 + $0x1], 0 }
   0x2   :  { %10 = vsyncpa [#allocation4], 0 }
   0x3   :  { %12 = vsyncpa [#allocation4 + $0x1], 0  ;;  %s526_s9 = smov 0   ;;  %s528_s10 = smov 0  }
   0x4   :  { %s530_s11 = smov 0   ;;  %s532_s12 = smov 0  }
   0x5   :  { %s534_s13 = smov 0   ;;  %s536_s14 = smov 0  }
   0x6 LB: > { %s316_s15 = sadd.s32 4294967295, %s506_s14   ;;  %s317_s16 = sadd.s32 4294967294, %s506_s14   ;;  %s506_s14 = sphi %s536_s14, %s18_s14   ;;  %s502_s13 = sphi %s534_s13, %s719_s13   ;;  %s498_s12 = sphi %s532_s12, %s718_s12   ;;  %s494_s11 = sphi %s530_s11, %s717_s11   ;;  %s490_s10 = sphi %s528_s10, %s716_s10   ;;  %s486_s9 = sphi %s526_s9, %s715_s9  }
   0x7   : > { %s27_s17 = sadd.s32 1, %s502_s13  ;;  %s65_s18 = sadd.s32 1, %s494_s11 }
   0x8   : > { %p28_p0 = scmp.ge.s32.totalorder %s27_s17, 2  ;;  %p72_p1 = scmp.ne.s32.totalorder %s494_s11, %s490_s10 }
   0x9   : > { %p73_p2 = scmp.eq.s32.totalorder %s506_s14, 0  ;;  %p78_p3 = scmp.ne.s32.totalorder %s490_s10, %s486_s9 }
   0xa   : > { %s721_s17 = smov (%p28_p0, %s27_s17), 0  ;;  %p79_p5 = scmp.eq.s32.totalorder %s316_s15, 0 }
   0xb   : > { %p567_p4 = por %p73_p2, %p72_p1  ;;  %s61_s20 = ssub.s32 %s502_s13, %s721_s17 }
   0xc   : > { %p104_p6 = scmp.eq.s32.totalorder %s316_s15, 1  ;;  %p63_p7 = scmp.eq.s32.totalorder %s61_s20, 0 }
   0xd   : > { %p573_p8 = por %p79_p5, %p78_p3  ;;  %p110_p10 = scmp.eq.s32.totalorder %s317_s16, 1 }
   0xe   : > { %p577_p9 = por %p104_p6, %p72_p1  ;;  %p342_p13 = scmp.lt.s32.totalorder %s506_s14, 2 }
   0xf   : > { %s582_s23 = scalar_select %p63_p7, %s494_s11, %s65_s18  }
  0x10   : > { %s707_s22 = scalar_select %p577_p9, 1, 0 }
  0x11   : > { %p584_p11 = por %p110_p10, %p78_p3  ;;  %s137_s25 = sand.u32 1, %s494_s11  }
  0x12   : > { %s321_s26 = sshll.u32 %s137_s25, 3  ;;  %s322_s27 = sshll.u32 %s502_s13, 7 }
  0x13   : > { %s708_s24 = scalar_select %p584_p11, 1, 0 }
  0x14   : > { %s595_s30 = scalar_lea.hbm %s702_s1, %s322_s27  ;;  %s141_s3 = scalar_lea.vmem [#allocation2], %s321_s26 }
  0x15   : > { %s150_s4 = sshll.u32 %s141_s3, 4  ;;  %p601_p0 = pnand %p342_p13, %p567_p4  ;;  %s597_s4 = int_to_ptr.vmem [resolvable:$true] %s150_s4 }
  0x16   : > { %s138_s6 = scalar_lea.sflag [#allocation3], %s137_s25  ;;  %s394_s7 = scalar_lea.hbm %s595_s30, 128 }
  0x17   : > { %p395_p3 = scmp.ne.s32.totalorder %s595_s30, %s394_s7  ;;  %p396_p5 = pneg %p601_p0 }
  0x18   : > { %s399_s16 = scalar_lea.hbm %s702_s1, 256  ;;  %p400_p4 = scmp.lt.u32.totalorder %s595_s30, %s702_s1 }
  0x19   : > { %p397_p6 = pnand %p396_p5, %p395_p3  ;;  %p401_p10 = scmp.lt.u32.totalorder %s399_s16, %s394_s7 }
  0x1a   : > { %p403_p12 = scmp.lt.u32.totalorder %s394_s7, %s595_s30 }
  0x1b   : > { %p398_p7 = pneg %p397_p6  ;;  %p402_p13 = por %p401_p10, %p400_p4 }
  0x1d   : > { %p404_p1 = por %p403_p12, %p402_p13 }
  0x1f   : > { %p405_p2 = pnand %p404_p1, %p398_p7 }
  0x21   : > { %408 = shalt.err (!%p405_p2)
}
  0x22   : > { %s409_s20 = scalar_lea.vmem %s597_s4, 128  ;;  %s508_s25 = smov [#allocation2]  }
  0x23   : > { %p410_p3 = scmp.ne.s32.totalorder %s597_s4, %s409_s20  ;;  %s414_s26 = sshll.u32 %s508_s25, 4  ;;  %s415_s26 = int_to_ptr.vmem [resolvable:$false] %s414_s26 }
  0x24   : > { %s416_s27 = scalar_lea.vmem %s415_s26, 256  ;;  %p417_p9 = scmp.lt.s32.totalorder %s597_s4, %s415_s26 }
  0x25   : > { %p412_p6 = pnand %p410_p3, %p396_p5  ;;  %p418_p4 = scmp.lt.s32.totalorder %s416_s27, %s409_s20 }
  0x27   : > { %p413_p11 = pneg %p412_p6  ;;  %p419_p10 = por %p418_p4, %p417_p9 }
  0x29   : > { %p420_p12 = pnand %p419_p10, %p413_p11 }
  0x2b   : > { %423 = shalt.err (!%p420_p12)
}
  0x2c   : > { %337 = dma.hbm_to_vmem [thread:$0]  (!%p601_p0), %s595_s30, 128, %s597_s4, %s138_s6  }
  0x2d   : > { %p710_p1 = scmp.lt.s32.totalorder %s506_s14, 3  ;;  %p711_p2 = scmp.ge.s32.totalorder %s506_s14, 1 }
  0x2f   : > { %p156_p5 = pnand %p711_p2, %p710_p1 }
  0x30   : > { %s637_s28 = sand.u32 (!%p156_p5), 1, %s490_s10  }
  0x31   : > { %159 = sbr.rel (%p156_p5) target bundleno = 203 (0xcb), region = 28  ;;  %s324_s29 = sshll.u32 (!%p156_p5), %s637_s28, 3 }
  0x32   : > { %s162_s3 = scalar_lea.sflag (!%p156_p5), [#allocation3], %s637_s28  ;;  %s165_s7 = scalar_lea.vmem (!%p156_p5), [#allocation2], %s324_s29 }
  0x38   : > { %477 = dma.done.wait (%p573_p8), %s162_s3, 128  }
  0x39   : > { %479 = vsyncadd (%p573_p8), %s162_s3, 4294967168  ;;  %v509_v0 = vmov 0   ;;  %v195_v1 = vld [vmem:[%s701_s0] sm:$0xff]  ;;  %s327_s5 = sshll.u32 %s498_s12, 7  ;;  %s189_s6 = scalar_lea.vmem [#allocation5], %s324_s29 }
  0x3a   : > { %393 = vset.pattern.permute.xlu0 %v509_v0  ;;  %v194_v2 = vld [vmem:[%s165_s7] sm:$0xff]  ;;  %s219_s8 = sshll.u32 %s189_s6, 4  ;;  %s652_s21 = scalar_lea.hbm %s703_s2, %s327_s5  ;;  %s654_s8 = int_to_ptr.vmem [resolvable:$true] %s219_s8 }
  0x3b   : > { %198 = vperm.xlu0 %393, %v195_v1   ;;  %s204_s18 = scalar_lea.sflag [#allocation4], %s637_s28  ;;  %s424_s19 = scalar_lea.vmem %s654_s8, 128 }
  0x3c   : > { %p425_p8 = scmp.ne.s32.totalorder %s654_s8, %s424_s19  ;;  %p712_p9 = scmp.ne.s32.totalorder %s707_s22, 0 }
  0x3d   : > { %s510_s12 = smov [#allocation5]  }
  0x3e   : > { %p426_p11 = pnand %p425_p8, %p712_p9  ;;  %s428_s20 = sshll.u32 %s510_s12, 4  ;;  %s429_s20 = int_to_ptr.vmem [resolvable:$false] %s428_s20 }
  0x3f   : > { %s430_s25 = scalar_lea.vmem %s429_s20, 256  ;;  %p431_p7 = scmp.lt.s32.totalorder %s654_s8, %s429_s20 }
  0x40   : > { %p427_p0 = pneg %p426_p11  ;;  %p432_p13 = scmp.lt.s32.totalorder %s430_s25, %s424_s19 }
  0x42   : > { %p433_p3 = por %p432_p13, %p431_p7 }
  0x44   : > { %p434_p6 = pnand %p433_p3, %p427_p0 }
  0xba   : > { %v199_v3 = vpop.permute.xlu0 %198 }
  0xbb   : > { %v201_v4 = vmul.f32 %v199_v3, %v194_v2 }
  0xbd   : > { %202 = vst [vmem:[%s189_s6] sm:$0xff] %v201_v4 }
  0xbe   : > { %437 = shalt.err (!%p434_p6)
}
  0xbf   : > { %s438_s26 = scalar_lea.hbm %s652_s21, 128  ;;  %s442_s29 = scalar_lea.hbm %s703_s2, 256 }
  0xc0   : > { %p439_p4 = scmp.ne.s32.totalorder %s652_s21, %s438_s26  ;;  %p443_p1 = scmp.lt.u32.totalorder %s652_s21, %s703_s2 }
  0xc1   : > { %p444_p2 = scmp.lt.u32.totalorder %s442_s29, %s438_s26  ;;  %p446_p8 = scmp.lt.u32.totalorder %s438_s26, %s652_s21 }
  0xc2   : > { %p440_p10 = pnand %p439_p4, %p712_p9 }
  0xc3   : > { %p445_p5 = por %p444_p2, %p443_p1 }
  0xc4   : > { %p441_p12 = pneg %p440_p10 }
  0xc5   : > { %p447_p11 = por %p446_p8, %p445_p5 }
  0xc7   : > { %p448_p0 = pnand %p447_p11, %p441_p12 }
  0xc9   : > { %451 = shalt.err (!%p448_p0)
}
  0xca   : > { %332 = dma.vmem_to_hbm [thread:$0]  (%p712_p9), %s654_s8, 128, %s652_s21, %s204_s18  }
  0xcb PF: > { %s231_s30 = sand.u32 1, %s486_s9   ;;  %p713_p7 = scmp.ne.s32.totalorder %s708_s24, 0 }
  0xcc   : > { %p714_p13 = scmp.ge.s32.totalorder %s506_s14, 2  ;;  %s232_s4 = scalar_lea.sflag [#allocation4], %s231_s30 }
  0xce   : > { %p339_p3 = pnand %p714_p13, %p713_p7 }
  0xd0   : > { %481 = dma.done.wait (!%p339_p3), %s232_s4, 128  }
  0xd1   : > { %483 = vsyncadd (!%p339_p3), %s232_s4, 4294967168  ;;  %s18_s14 = sadd.s32 1, %s506_s14   ;;  %s715_s9 = smov %s490_s10 }
  0xd2   : > { %p15_p6 = scmp.ge.s32.totalorder %s18_s14, 4   ;;  %s716_s10 = smov %s494_s11 }
  0xd3   : > { %s717_s11 = smov %s582_s23  ;;  %s718_s12 = smov %s502_s13 }
  0xd4   : > { %s719_s13 = smov %s721_s17  ;;  %17 = sbr.rel (!%p15_p6) target bundleno = 6 (0x6), region = 76 }
  0xdb   :  { %237 = vsyncpa [#allocation3], 1 }
  0xdc   :  { %239 = vsyncpa [#allocation3 + $0x1], 1 }
  0xdd   :  { %240 = vsyncpa [#allocation4], 1 }
  0xde   :  { %242 = vsyncpa [#allocation4 + $0x1], 1 }

</bundles_post_ra>
